<compile_context>
chip_gen: v5e
topology: v5e:2x2
jax: 0.10.0
libtpu: 0.0.40
codegen_flags: <defaults>
</compile_context>

<pallas_src>
import functools

import jax
import jax.numpy as jnp
from jax.experimental import pallas as pl
from jax.experimental.pallas import tpu as pltpu

_LANES = 128


# ----------------------------- Pallas kernel --------------------------------

def _afm_kernel(x16_ref, x32_ref, w1h_ref, w1l_ref, w2_ref, bias_ref,
                o_ref, acc_ref, *, inv_hw):
    """One (batch, spatial-tile) grid step.

    x16_ref  : (1, C16, TM)      f32   feat16 slab (channel-first, lane-dense M)
    x32_ref  : (1, C32, TM)      f32   nearest-upsampled feat32 slab
    w1h_ref  : (Cout, C16)       bf16  conv 1x1 weights (feat16 half), BN1 scale folded
    w1l_ref  : (Cout, C32)       bf16  conv 1x1 weights (feat32 half), BN1 scale folded
    w2_ref   : (Cout, Cout)      f32   conv_atten weights, bn_atten scale folded
    bias_ref : (Cout, 2)         f32   col 0 = folded BN1 bias, col 1 = folded bn_atten bias
    o_ref    : (1, Cout, LANES)  f32   sigmoid attention, replicated over lanes
    acc_ref  : (Cout, 1)         f32   per-batch pooled-sum accumulator (VMEM scratch)
    """
    t = pl.program_id(1)
    nt = pl.num_programs(1)

    @pl.when(t == 0)
    def _init():
        acc_ref[...] = jnp.zeros_like(acc_ref)

    # Conv1x1 (+ folded BN1 scale) as two lane-dense MXU matmuls, f32 accumulate.
    x16 = x16_ref[0].astype(jnp.bfloat16)                      # (C16, TM)
    x32 = x32_ref[0].astype(jnp.bfloat16)                      # (C32, TM)
    b1 = bias_ref[:, 0:1]                                      # (Cout, 1)

    feat = jnp.dot(w1h_ref[...], x16, preferred_element_type=jnp.float32)
    feat = feat + jnp.dot(w1l_ref[...], x32, preferred_element_type=jnp.float32)
    feat = jnp.maximum(feat + b1, 0.0)                         # (Cout, TM), f32

    # Global-average-pool partial sum: cross-lane reduce on the XLU.
    acc_ref[...] += jnp.sum(feat, axis=1, keepdims=True)       # (Cout, 1)

    @pl.when(t == nt - 1)
    def _finalize():
        cout = w2_ref.shape[0]
        lanes = o_ref.shape[-1]
        b2 = bias_ref[:, 1:2]                                  # (Cout, 1)
        pooled = jnp.broadcast_to(acc_ref[...] * inv_hw, (cout, lanes))
        z = jnp.dot(w2_ref[...], pooled, preferred_element_type=jnp.float32) + b2
        o_ref[...] = jax.nn.sigmoid(z)[None].astype(o_ref.dtype)


# ------------------------------- glue / wrapper ------------------------------

def _nearest_resize_nchw(x, out_h, out_w):
    """F.interpolate(x, (out_h, out_w), mode='nearest') for NCHW input."""
    _, _, in_h, in_w = x.shape
    idx_h = (jnp.arange(out_h) * in_h) // out_h
    idx_w = (jnp.arange(out_w) * in_w) // out_w
    return x[:, :, idx_h, :][:, :, :, idx_w]


def _fold_bn(gamma, beta, mean, var, eps=1e-5):
    scale = gamma / jnp.sqrt(var + eps)
    bias = beta - mean * scale
    return scale, bias


def _pick_tile_m(hw, tile_m):
    """Largest multiple-of-128 divisor of hw that is <= tile_m (else full hw)."""
    if hw % _LANES != 0:
        return hw
    tm = max(_LANES, (min(tile_m, hw) // _LANES) * _LANES)
    while hw % tm != 0:
        tm -= _LANES
    return tm


def init_params(key, in_chan, out_chan):
    ks = jax.random.split(key, 10)
    p = {}
    # conv (1x1, in_chan -> out_chan, no bias), stored PyTorch-style (Cout, Cin)
    p["w1"] = 0.1 * jax.random.normal(ks[0], (out_chan, in_chan), jnp.float32)
    # conv_atten (1x1, out_chan -> out_chan, no bias), stored (Cout_out, Cout_in)
    p["w2"] = 0.1 * jax.random.normal(ks[1], (out_chan, out_chan), jnp.float32)
    for name, k0 in (("bn1", 2), ("bna", 6)):
        p[name + "_gamma"] = 1.0 + 0.1 * jax.random.normal(ks[k0], (out_chan,), jnp.float32)
        p[name + "_beta"] = 0.1 * jax.random.normal(ks[k0 + 1], (out_chan,), jnp.float32)
        p[name + "_mean"] = 0.1 * jax.random.normal(ks[k0 + 2], (out_chan,), jnp.float32)
        p[name + "_var"] = 0.5 + jax.random.uniform(ks[k0 + 3], (out_chan,), jnp.float32)
    return p


@functools.partial(jax.jit, static_argnames=("tile_m",))
def afm_forward(feat16, feat32, params, *, tile_m=1024):
    n, c16, h, w = feat16.shape
    c32 = feat32.shape[1]
    cout = params["w1"].shape[0]
    hw = h * w

    # --- fold BN scales into the conv weights (inference-mode BN) ---
    s1, b1 = _fold_bn(params["bn1_gamma"], params["bn1_beta"],
                      params["bn1_mean"], params["bn1_var"])
    s2, b2 = _fold_bn(params["bna_gamma"], params["bna_beta"],
                      params["bna_mean"], params["bna_var"])
    w1s = params["w1"] * s1[:, None]                   # (Cout, Cin)
    w1h = w1s[:, :c16].astype(jnp.bfloat16)            # feat16 channels come first
    w1l = w1s[:, c16:].astype(jnp.bfloat16)            # feat32 channels
    w2s = params["w2"] * s2[:, None]                   # (Cout, Cout)
    bias = jnp.stack([b1, b2], axis=1)                 # (Cout, 2)

    # Nearest upsample of feat32 (wrapper-side gather); concat + transpose are
    # fused into the kernel (split weights, channel-first layout).
    feat32_up = _nearest_resize_nchw(feat32, h, w)     # (N, C32, H, W)

    # Channel-first, lane-dense layout: (N, C, H*W) — free reshapes of NCHW.
    x16 = feat16.reshape(n, c16, hw)
    x32 = feat32_up.reshape(n, c32, hw)

    tm = _pick_tile_m(hw, tile_m)
    n_tiles = hw // tm

    kernel = functools.partial(_afm_kernel, inv_hw=1.0 / float(hw))
    out = pl.pallas_call(
        kernel,
        out_shape=jax.ShapeDtypeStruct((n, cout, _LANES), jnp.float32),
        grid=(n, n_tiles),
        in_specs=[
            pl.BlockSpec((1, c16, tm), lambda b, t: (b, 0, t)),
            pl.BlockSpec((1, c32, tm), lambda b, t: (b, 0, t)),
            pl.BlockSpec((cout, c16), lambda b, t: (0, 0)),   # resident weights
            pl.BlockSpec((cout, c32), lambda b, t: (0, 0)),
            pl.BlockSpec((cout, cout), lambda b, t: (0, 0)),
            pl.BlockSpec((cout, 2), lambda b, t: (0, 0)),
        ],
        out_specs=pl.BlockSpec((1, cout, _LANES), lambda b, t: (b, 0, 0)),
        scratch_shapes=[pltpu.VMEM((cout, 1), jnp.float32)],
        compiler_params=pltpu.CompilerParams(
            dimension_semantics=("parallel", "arbitrary"),
            vmem_limit_bytes=max(32 * 1024 * 1024, 16 * (c16 + c32) * tm * 4),
        ),
    )(x16, x32, w1h, w1l, w2s, bias)

    # Lane 0 of the replicated slab, back to the PyTorch (N, Cout, 1, 1) layout.
    return out[:, :, 0][:, :, None, None]


# ------------------------------ pure-JAX reference ---------------------------

def afm_reference(feat16, feat32, params):
    n, _, h, w = feat16.shape
    feat32_up = _nearest_resize_nchw(feat32, h, w)
    fcat = jnp.concatenate([feat16, feat32_up], axis=1)        # (N, Cin, H, W)

    def bn(y, prefix):                                         # eval-mode BN, NCHW
        shp = (1, -1, 1, 1)
        g = params[prefix + "_gamma"].reshape(shp)
        b = params[prefix + "_beta"].reshape(shp)
        m = params[prefix + "_mean"].reshape(shp)
        v = params[prefix + "_var"].reshape(shp)
        return (y - m) / jnp.sqrt(v + 1e-5) * g + b

    feat = jax.nn.relu(bn(jnp.einsum("oc,nchw->nohw", params["w1"], fcat), "bn1"))
    pooled = jnp.mean(feat, axis=(2, 3))                       # avg_pool2d, full spatial
    atten = jnp.einsum("oi,ni->no", params["w2"], pooled)      # conv_atten 1x1
    atten = bn(atten[:, :, None, None], "bna")
    return jax.nn.sigmoid(atten)                               # (N, Cout, 1, 1)


# ----------------------------------- main ------------------------------------

if __name__ == "__main__":
    key = jax.random.PRNGKey(0)
    k16, k32, kp = jax.random.split(key, 3)

    # feat16 is the high-res map, feat32 the low-res map (nearest-upsampled 2x).
    feat16 = jax.random.normal(k16, (2, 4, 16, 16), jnp.float32)
    feat32 = jax.random.normal(k32, (2, 4, 8, 8), jnp.float32)

    in_chan = feat16.shape[1] + feat32.shape[1]   # 8
    out_chan = 8
    params = init_params(kp, in_chan, out_chan)

    # tile_m=128 splits the 16x16 map into 2 spatial tiles per batch element,
    # exercising the accumulator init / accumulate / finalize path.
    out = afm_forward(feat16, feat32, params, tile_m=128)
    out = jax.block_until_ready(out)

    ref = afm_reference(feat16, feat32, params)
    assert out.shape == (2, out_chan, 1, 1), out.shape
    # bf16 matmul operands (f32 accumulation) vs the pure-f32 reference:
    # observed error ~1e-3, comfortably inside this tolerance.
    assert jnp.allclose(out, ref, rtol=0.0, atol=2e-2), (out, ref)

    print("KERNEL_OK")
</pallas_src>

<mosaic_0001>
module attributes {stable_mosaic.version = 11 : i64} {
  func.func @_afm_kernel(%arg0: i32, %arg1: i32, %arg2: memref<1x4x128xf32, #tpu.memory_space<vmem>>, %arg3: memref<1x4x128xf32, #tpu.memory_space<vmem>>, %arg4: memref<8x4xbf16, #tpu.memory_space<vmem>>, %arg5: memref<8x4xbf16, #tpu.memory_space<vmem>>, %arg6: memref<8x8xf32, #tpu.memory_space<vmem>>, %arg7: memref<8x2xf32, #tpu.memory_space<vmem>>, %arg8: memref<1x8x128xf32, #tpu.memory_space<vmem>>, %arg9: memref<8x1xf32, #tpu.memory_space<vmem>>) attributes {dimension_semantics = [#tpu.dimension_semantics<parallel>, #tpu.dimension_semantics<arbitrary>], iteration_bounds = array<i64: 2, 2>, scalar_prefetch = 0 : i64, scratch_operands = 1 : i64, tpu.core_type = #tpu.core_type<tc>, window_params = [{transform_indices = @transform_0, window_bounds = array<i64: 1, 4, 128>}, {transform_indices = @transform_1, window_bounds = array<i64: 1, 4, 128>}, {pipeline_mode = #tpu.pipeline_mode<synchronous>, transform_indices = @transform_2, window_bounds = array<i64: 8, 4>}, {pipeline_mode = #tpu.pipeline_mode<synchronous>, transform_indices = @transform_3, window_bounds = array<i64: 8, 4>}, {pipeline_mode = #tpu.pipeline_mode<synchronous>, transform_indices = @transform_4, window_bounds = array<i64: 8, 8>}, {pipeline_mode = #tpu.pipeline_mode<synchronous>, transform_indices = @transform_5, window_bounds = array<i64: 8, 2>}, {transform_indices = @transform_6, window_bounds = array<i64: 1, 8, 128>}]} {
    %c0_i32 = arith.constant 0 : i32
    %0 = arith.cmpi eq, %arg1, %c0_i32 : i32
    %1 = arith.extui %0 : i1 to i32
    %c0_i32_0 = arith.constant 0 : i32
    %2 = arith.cmpi ne, %1, %c0_i32_0 : i32
    scf.if %2 {
      %cst_20 = arith.constant 0.000000e+00 : f32
      %27 = vector.broadcast %cst_20 : f32 to vector<8x1xf32>
      %c0_21 = arith.constant 0 : index
      %c0_22 = arith.constant 0 : index
      %28 = vector.load %arg9[%c0_21, %c0_22] : memref<8x1xf32, #tpu.memory_space<vmem>>, vector<8x1xf32>
      tpu.vector_store %arg9[%c0_21, %c0_22], %27 {strides = array<i32>} : memref<8x1xf32, #tpu.memory_space<vmem>>, vector<8x1xf32>,
    } else {
    }
    %c0 = arith.constant 0 : index
    %c0_1 = arith.constant 0 : index
    %c0_2 = arith.constant 0 : index
    %3 = vector.load %arg2[%c0, %c0_1, %c0_2] : memref<1x4x128xf32, #tpu.memory_space<vmem>>, vector<1x4x128xf32>
    %4 = vector.shape_cast %3 : vector<1x4x128xf32> to vector<4x128xf32>
    %5 = arith.truncf %4 : vector<4x128xf32> to vector<4x128xbf16>
    %c0_3 = arith.constant 0 : index
    %c0_4 = arith.constant 0 : index
    %c0_5 = arith.constant 0 : index
    %6 = vector.load %arg3[%c0_3, %c0_4, %c0_5] : memref<1x4x128xf32, #tpu.memory_space<vmem>>, vector<1x4x128xf32>
    %7 = vector.shape_cast %6 : vector<1x4x128xf32> to vector<4x128xf32>
    %8 = arith.truncf %7 : vector<4x128xf32> to vector<4x128xbf16>
    %c0_6 = arith.constant 0 : index
    %c0_7 = arith.constant 0 : index
    %9 = vector.load %arg7[%c0_6, %c0_7] : memref<8x2xf32, #tpu.memory_space<vmem>>, vector<8x1xf32>
    %c0_8 = arith.constant 0 : index
    %c0_9 = arith.constant 0 : index
    %10 = vector.load %arg4[%c0_8, %c0_9] : memref<8x4xbf16, #tpu.memory_space<vmem>>, vector<8x4xbf16>
    %cst = arith.constant dense<0.000000e+00> : vector<8x128xf32>
    %11 = tpu.matmul %10, %5, %cst {dimension_numbers = #tpu.dot_dimension_numbers<[1], [0], [0], [1], [0, 0, 1, 1], [], []>} : vector<8x4xbf16>, vector<4x128xbf16>, vector<8x128xf32> -> vector<8x128xf32>
    %c0_10 = arith.constant 0 : index
    %c0_11 = arith.constant 0 : index
    %12 = vector.load %arg5[%c0_10, %c0_11] : memref<8x4xbf16, #tpu.memory_space<vmem>>, vector<8x4xbf16>
    %cst_12 = arith.constant dense<0.000000e+00> : vector<8x128xf32>
    %13 = tpu.matmul %12, %8, %cst_12 {dimension_numbers = #tpu.dot_dimension_numbers<[1], [0], [0], [1], [0, 0, 1, 1], [], []>} : vector<8x4xbf16>, vector<4x128xbf16>, vector<8x128xf32> -> vector<8x128xf32>
    %14 = arith.addf %11, %13 : vector<8x128xf32>
    %15 = vector.broadcast %9 : vector<8x1xf32> to vector<8x128xf32>
    %16 = arith.addf %14, %15 : vector<8x128xf32>
    %cst_13 = arith.constant 0.000000e+00 : f32
    %17 = vector.broadcast %cst_13 : f32 to vector<8x128xf32>
    %18 = arith.maximumf %16, %17 : vector<8x128xf32>
    %c0_14 = arith.constant 0 : index
    %c0_15 = arith.constant 0 : index
    %19 = vector.load %arg9[%c0_14, %c0_15] : memref<8x1xf32, #tpu.memory_space<vmem>>, vector<8x1xf32>
    %cst_16 = arith.constant dense<0.000000e+00> : vector<8xf32>
    %20 = vector.multi_reduction <add>, %18, %cst_16 [1] : vector<8x128xf32> to vector<8xf32>
    %21 = vector.shape_cast %20 : vector<8xf32> to vector<8x1xf32>
    %22 = arith.addf %19, %21 : vector<8x1xf32>
    %c0_17 = arith.constant 0 : index
    %c0_18 = arith.constant 0 : index
    %23 = vector.load %arg9[%c0_17, %c0_18] : memref<8x1xf32, #tpu.memory_space<vmem>>, vector<8x1xf32>
    tpu.vector_store %arg9[%c0_17, %c0_18], %22 {strides = array<i32>} : memref<8x1xf32, #tpu.memory_space<vmem>>, vector<8x1xf32>,
    %c1_i32 = arith.constant 1 : i32
    %24 = arith.cmpi eq, %arg1, %c1_i32 : i32
    %25 = arith.extui %24 : i1 to i32
    %c0_i32_19 = arith.constant 0 : i32
    %26 = arith.cmpi ne, %25, %c0_i32_19 : i32
    scf.if %26 {
      %c0_20 = arith.constant 0 : index
      %c1 = arith.constant 1 : index
      %27 = vector.load %arg7[%c0_20, %c1] : memref<8x2xf32, #tpu.memory_space<vmem>>, vector<8x1xf32>
      %c0_21 = arith.constant 0 : index
      %c0_22 = arith.constant 0 : index
      %28 = vector.load %arg9[%c0_21, %c0_22] : memref<8x1xf32, #tpu.memory_space<vmem>>, vector<8x1xf32>
      %cst_23 = arith.constant 3.906250e-03 : f32
      %29 = vector.broadcast %cst_23 : f32 to vector<8x1xf32>
      %30 = arith.mulf %28, %29 : vector<8x1xf32>
      %31 = vector.shape_cast %30 : vector<8x1xf32> to vector<8x1xf32>
      %32 = vector.broadcast %31 : vector<8x1xf32> to vector<8x128xf32>
      %c0_24 = arith.constant 0 : index
      %c0_25 = arith.constant 0 : index
      %33 = vector.load %arg6[%c0_24, %c0_25] : memref<8x8xf32, #tpu.memory_space<vmem>>, vector<8x8xf32>
      %cst_26 = arith.constant dense<0.000000e+00> : vector<8x128xf32>
      %34 = tpu.matmul %33, %32, %cst_26 {dimension_numbers = #tpu.dot_dimension_numbers<[1], [0], [0], [1], [0, 0, 1, 1], [], []>} : vector<8x8xf32>, vector<8x128xf32>, vector<8x128xf32> -> vector<8x128xf32>
      %35 = vector.broadcast %27 : vector<8x1xf32> to vector<8x128xf32>
      %36 = arith.addf %34, %35 : vector<8x128xf32>
      %37 = arith.negf %36 : vector<8x128xf32>
      %38 = math.exp %37 : vector<8x128xf32>
      %cst_27 = arith.constant 1.000000e+00 : f32
      %39 = vector.broadcast %cst_27 : f32 to vector<8x128xf32>
      %40 = arith.addf %39, %38 : vector<8x128xf32>
      %41 = arith.divf %39, %40 : vector<8x128xf32>
      %42 = vector.shape_cast %41 : vector<8x128xf32> to vector<1x8x128xf32>
      %c0_28 = arith.constant 0 : index
      %c0_29 = arith.constant 0 : index
      %c0_30 = arith.constant 0 : index
      %43 = vector.load %arg8[%c0_28, %c0_29, %c0_30] : memref<1x8x128xf32, #tpu.memory_space<vmem>>, vector<1x8x128xf32>
      tpu.vector_store %arg8[%c0_28, %c0_29, %c0_30], %42 {strides = array<i32>} : memref<1x8x128xf32, #tpu.memory_space<vmem>>, vector<1x8x128xf32>,
    } else {
    }
    return
  }
  func.func @transform_0(%arg0: i32, %arg1: i32) -> (i32, i32, i32) {
    %c0_i32 = arith.constant 0 : i32
    %c0_i32_0 = arith.constant 0 : i32
    return %arg0, %c0_i32, %arg1 : i32, i32, i32
  }
  func.func @transform_1(%arg0: i32, %arg1: i32) -> (i32, i32, i32) {
    %c0_i32 = arith.constant 0 : i32
    %c0_i32_0 = arith.constant 0 : i32
    return %arg0, %c0_i32, %arg1 : i32, i32, i32
  }
  func.func @transform_2(%arg0: i32, %arg1: i32) -> (i32, i32) {
    %c0_i32 = arith.constant 0 : i32
    %c0_i32_0 = arith.constant 0 : i32
    %c0_i32_1 = arith.constant 0 : i32
    return %c0_i32, %c0_i32_0 : i32, i32
  }
  func.func @transform_3(%arg0: i32, %arg1: i32) -> (i32, i32) {
    %c0_i32 = arith.constant 0 : i32
    %c0_i32_0 = arith.constant 0 : i32
    %c0_i32_1 = arith.constant 0 : i32
    return %c0_i32, %c0_i32_0 : i32, i32
  }
  func.func @transform_4(%arg0: i32, %arg1: i32) -> (i32, i32) {
    %c0_i32 = arith.constant 0 : i32
    %c0_i32_0 = arith.constant 0 : i32
    %c0_i32_1 = arith.constant 0 : i32
    return %c0_i32, %c0_i32_0 : i32, i32
  }
  func.func @transform_5(%arg0: i32, %arg1: i32) -> (i32, i32) {
    %c0_i32 = arith.constant 0 : i32
    %c0_i32_0 = arith.constant 0 : i32
    %c0_i32_1 = arith.constant 0 : i32
    return %c0_i32, %c0_i32_0 : i32, i32
  }
  func.func @transform_6(%arg0: i32, %arg1: i32) -> (i32, i32, i32) {
    %c0_i32 = arith.constant 0 : i32
    %c0_i32_0 = arith.constant 0 : i32
    %c0_i32_1 = arith.constant 0 : i32
    return %arg0, %c0_i32, %c0_i32_0 : i32, i32, i32
  }
}

</mosaic_0001>

<bundles_post_ra>
// kernel: afm_forward.1
= control target key start
LH: loop header
LB: loop body
LE: loop exit
PB: predicated region body
PF: predicated region fallthrough
CT: control target
= control target key end

     0   :  { %s669_s21 = smov 0   ;;  %s671_s22 = smov 0   ;;  %s747_s0 = inlined_call_operand.vmem [shape: f32[2,4,256], index: 0, kind: input, shape index: {}]   ;;  %s748_s1 = inlined_call_operand.vmem [shape: f32[2,4,256], index: 1, kind: input, shape index: {}]   ;;  %s749_s2 = inlined_call_operand.vmem [shape: bf16[8,4], index: 2, kind: input, shape index: {}]   ;;  %s750_s3 = inlined_call_operand.vmem [shape: bf16[8,4], index: 3, kind: input, shape index: {}]   ;;  %s751_s4 = inlined_call_operand.vmem [shape: f32[8,8], index: 4, kind: input, shape index: {}]   ;;  %s752_s5 = inlined_call_operand.vmem [shape: f32[8,2], index: 5, kind: input, shape index: {}]   ;;  %s753_s6 = inlined_call_operand.vmem [shape: f32[2,8,128], index: 6, kind: output, shape index: {}]  }
   0x1   :  { %s673_s23 = smov 0   ;;  %s675_s24 = smov 0  }
   0x2   :  { %s677_s25 = smov 0  }
   0x3 LB: > { %s25_s26 = sadd.s32 1, %s620_s23  ;;  %s28_s27 = sadd.s32 1, %s624_s24  ;;  %s628_s25 = sphi %s677_s25, %s16_s25   ;;  %s624_s24 = sphi %s675_s24, %s757_s24   ;;  %s620_s23 = sphi %s673_s23, %s756_s23   ;;  %s616_s22 = sphi %s671_s22, %s755_s22   ;;  %s612_s21 = sphi %s669_s21, %s754_s21  }
   0x4   : > { %p26_p0 = scmp.ge.s32.totalorder %s25_s26, 2  ;;  %p525_p1 = scmp.ge.s32.totalorder %s628_s25, 1 }
   0x5   : > { %p244_p2 = scmp.lt.s32.totalorder %s628_s25, 5 }
   0x6   : > { %s759_s26 = smov (%p26_p0, %s25_s26), 0  ;;  %s761_s27 = smov (!%p26_p0, %s28_s27), %s624_s24 }
   0x7   : > { %p245_p3 = pnand %p525_p1, %p244_p2  ;;  %p30_p4 = scmp.ge.s32.totalorder %s761_s27, 2 }
   0x8   : > { %p284_p5 = scmp.lt.s32.totalorder (!%p245_p3), %s616_s22, 1  ;;  %p286_p6 = scmp.lt.s32.totalorder (!%p245_p3), %s612_s21, 1 }
   0x9   : > { %s763_s27 = smov (%p30_p4, %s761_s27), 0  ;;  %248 = sbr.rel (%p245_p3) target bundleno = 566 (0x236), region = 44 }
   0xa   : > { %p531_p7 = scmp.ne.s32.totalorder (!%p245_p3), %s612_s21, 0 }
   0xe   : > { %s765_s22 = smov (!%p284_p5, %s616_s22), 1 }
   0xf   : > { %s287_s28 = scalar_select %p286_p6, %s612_s21, 1 }
  0x10   : > { %s526_s29 = sshll.u32 %s765_s22, 1  ;;  %s530_s30 = sshll.u32 %s765_s22, 3 }
  0x11   : > { %s289_s7 = sadd.s32 %s526_s29, %s287_s28  ;;  %s706_s10 = scalar_lea.vmem %s753_s6, %s530_s30 }
  0x12   : > { %s527_s11 = sshll.u32 %s289_s7, 2  ;;  %308 = sbr.rel (%p531_p7) target bundleno = 25 (0x19), region = 48 }
  0x13   : > { %s291_s14 = scalar_lea.vmem %s747_s0, %s527_s11  ;;  %s299_s17 = scalar_lea.vmem %s748_s1, %s527_s11 }
  0x17   : > { %vm309_vm0 = vcmask 7168   ;;  %v630_v0 = vmov 0.0  }
  0x18   : > { %310 = vst.msk [vmem:[#allocation2] sm:$0xff] %vm309_vm0, %v630_v0 }
  0x19 PF: > { %v313_v1 = vld [vmem:[%s299_s17] sm:$0xf]  ;;  %vm322_vm1 = vcmask 1041408   ;;  %v631_v6 = vmov 0   ;;  %vm318_vm2 = vcmask 31744   ;;  %vm369_vm3 = vcmask 7168  }
  0x1a   : > { %v311_v2 = vld [vmem:[%s291_s14] sm:$0xf]  ;;  %v314_v3 = vpack.c.bf16 %v313_v1, %v313_v1  ;;  %583 = vset.pattern.permute.xlu0 %v631_v6  ;;  %p534_p8 = scmp.ne.s32.totalorder %s612_s21, 1 }
  0x1b   : > { %v312_v4 = vpack.c.bf16 %v311_v2, %v311_v2  ;;  %v315_v5 = vld [vmem:[%s752_s5] sm:$0xff] }
  0x1c   : > { %v324_v7 = vsel %vm322_vm1, %v314_v3, 0  ;;  %360 = vperm.xlu0 %583, %v315_v5   ;;  %v317_v9 = vld [vmem:[%s750_s3] sm:$0xf] }
  0x1d   : > { %v343_v8 = vsel %vm322_vm1, %v312_v4, 0  ;;  %333 = vmatpush.bf16.msra.mxu0 %v324_v7  ;;  %v316_v10 = vld [vmem:[%s749_s2] sm:$0xf] }
  0x1e   : > { %352 = vmatpush.bf16.msra.mxu1 %v343_v8 }
  0x1f   : > { %v365_v19 = vld [vmem:[#allocation2] sm:$0xff] }
  0x20   : > { %532 = vmatmul.msk.bf16.vlgmr.msra.gmra.mxu0 %vm318_vm2, %v317_v9 }
  0x21   : > { %533 = vmatmul.msk.bf16.vlgmr.msra.gmra.mxu1 %vm318_vm2, %v316_v10 }
  0x8e   : > { %v361_v11 = vpop.permute.xlu0 %360 }
  0x9d   : > { %v335_v12 = vpop.f32.mrf.mxu0 }
  0x9e   : > { %v354_v13 = vpop.f32.mrf.mxu1 }
  0x9f   : > { %v355_v14 = vadd.f32 %v354_v13, %v335_v12 }
  0xa1   : > { %v363_v15 = vadd.f32 %v361_v11, %v355_v14 }
  0xa3   : > { %v364_v16 = vmax.f32 %v363_v15, 0.0 }
  0xa5   : > { %366 = vadd.xlane.f32.xlu0 %v364_v16  ;;  %v337_v17 = vpop.f32.mrf.mxu0 }
  0xa6   : > { %v356_v18 = vpop.f32.mrf.mxu1 }
 0x117   : > { %374 = sbr.rel (%p534_p8) target bundleno = 566 (0x236), region = 52 }
 0x118   : > { %v367_v20 = vpop.xlane.xlu0 %366 }
 0x119   : > { %v368_v21 = vadd.f32 %v367_v20, %v365_v19 }
 0x11b   : > { %370 = vst.msk [vmem:[#allocation2] sm:$0xff] %vm369_vm3, %v368_v21 }
 0x11c   : > { %v632_v23 = vmov 0   ;;  %v375_v25 = vld [vmem:[%s752_s5] sm:$0xff]  ;;  %v633_v26 = vmov 1   ;;  %vm389_vm4 = vcmask 64512  }
 0x11d   : > { %584 = vset.pattern.permute.xlu0 %v632_v23  ;;  %v383_v27 = vld [vmem:[%s751_s4] sm:$0xff] }
 0x122   : > { %v376_v22 = vld [vmem:[#allocation2] sm:$0xff] }
 0x123   : > { %v377_v24 = vmul.f32 0.00390625, %v376_v22 }
 0x125   : > { %380 = vperm.xlu0 %584, %v377_v24  }
 0x12d   : > { %585 = vset.pattern.permute.xlu0 %v633_v26 }
 0x12e   : > { %386 = vperm.xlu0 %585, %v375_v25  }
 0x197   : > { %v381_v28 = vpop.permute.xlu0 %380 }
 0x198   : > { %408 = vmatpush.msra.mxu0 %v381_v28 }
 0x199   : > { %535 = vmatmul.msk.f32.vlgmr.msra.gmra.mxu0 %vm389_vm4, %v383_v27 }
 0x1a0   : > { %v387_v29 = vpop.permute.xlu0 %386 }
 0x216   : > { %v410_v30 = vpop.f32.mrf.mxu0 }
 0x217   : > { %v411_v31 = vadd.f32 %v410_v30, %v387_v29 }
 0x219   : > { %v536_v32 = vmul.f32 -1.442695, %v411_v31 }
 0x21b   : > { %586 = vpow2.f32 %v536_v32 }
 0x221   : > { %v587_v33 = vpop.eup %586 }
 0x222   : > { %v416_v34 = vadd.f32 1.0, %v587_v33 }
 0x224   : > { %588 = vrcp.f32 %v416_v34  ;;  %v428_v38 = vand.u32 2147483648, %v416_v34  ;;  %v426_v40 = vand.u32 2147483647, %v416_v34  ;;  %vm422_vm6 = vweird.f32 %v416_v34 }
 0x226   : > { %v429_v42 = vor.u32 1.1754944e-38, %v428_v38  ;;  %vm427_vm8 = vcmp.eq.f32.partialorder %v426_v40, 8.507059e+37 }
 0x22a   : > { %v589_v35 = vpop.eup %588 }
 0x22b   : > { %v418_v36 = vmul.f32 %v589_v35, %v416_v34  ;;  %vm423_vm5 = vweird.f32 %v589_v35 }
 0x22c   : > { %vm424_vm7 = vmor %vm422_vm6, %vm423_vm5 }
 0x22d   : > { %v419_v37 = vsub.f32 1.0, %v418_v36 }
 0x22f   : > { %v420_v39 = vmul.f32 %v589_v35, %v419_v37 }
 0x231   : > { %v421_v41 = vadd.f32 %v589_v35, %v420_v39 }
 0x233   : > { %v425_v43 = vsel %vm424_vm7, %v589_v35, %v421_v41 }
 0x234   : > { %v430_v44 = vsel %vm427_vm8, %v429_v42, %v425_v43 }
 0x235   : > { %432 = vst [vmem:[%s706_s10] sm:$0xff] %v430_v44 }
 0x236 PF: > { %s16_s25 = sadd.s32 1, %s628_s25   ;;  %s754_s21 = smov %s620_s23 }
 0x237   : > { %p13_p9 = scmp.ge.s32.totalorder %s16_s25, 6   ;;  %s755_s22 = smov %s624_s24 }
 0x238   : > { %s756_s23 = smov %s759_s26  ;;  %s757_s24 = smov %s763_s27 }
 0x239   :  { %15 = sbr.rel (!%p13_p9) target bundleno = 3 (0x3), region = 85 }

</bundles_post_ra>
